<compile_context>
chip_gen: v6e
topology: v6e:2x2x1
jax: 0.10.0
libtpu: 0.0.40
codegen_flags: <defaults>
</compile_context>

<pallas_src>
import functools

import jax
import jax.numpy as jnp
from jax import lax
from jax.experimental import pallas as pl
from jax.experimental.pallas import tpu as pltpu

_LANE = 128


def _round_up(n, m):
    return ((n + m - 1) // m) * m


def _tpu_generation_info():
    """Best-effort chip query: (device_kind_lower, per-core VMEM bytes)."""
    kind = ""
    try:
        kind = jax.devices()[0].device_kind.lower()
    except Exception:
        pass
    vmem_cap = None
    try:
        vmem_cap = int(pltpu.get_tpu_info().vmem_capacity_bytes)
    except Exception:
        vmem_cap = None
    if not vmem_cap or vmem_cap <= 0:
        vmem_cap = (64 << 20) if "v7" in kind else (128 << 20)
    return kind, vmem_cap


# ----------------------------------------------------------------------------
# Kernels
# ----------------------------------------------------------------------------
def _mlp_resident_kernel(x_ref, w_in_ref, b_in_ref, w_h_ref, b_h_ref,
                         w_out_ref, b_out_ref, o_ref, *, n_hidden_layers):
    """All weights VMEM-resident; one batch tile per grid step."""
    # Input layer + ReLU (bf16 operands, f32 accumulation on the MXU).
    h = jnp.dot(x_ref[...], w_in_ref[...], preferred_element_type=jnp.float32)
    h = jnp.maximum(h + b_in_ref[...], 0.0)

    # Hidden layers: Linear -> ReLU -> Dropout(p=0.0) (identity).
    # TODO(synk): training-mode dropout (p>0) would need pltpu.prng_seed /
    #             pltpu.prng_random_bits; here dropout=0.0 so it is identity.
    def body(k, h):
        hk = jnp.dot(h.astype(w_h_ref.dtype), w_h_ref[k],
                     preferred_element_type=jnp.float32)
        return jnp.maximum(hk + b_h_ref[k], 0.0)

    h = lax.fori_loop(0, n_hidden_layers, body, h,
                      unroll=(n_hidden_layers <= 4))

    # Output layer (no activation); lane-dense padded output block.
    out = jnp.dot(h.astype(w_out_ref.dtype), w_out_ref[...],
                  preferred_element_type=jnp.float32)
    o_ref[...] = (out + b_out_ref[...]).astype(o_ref.dtype)


def _mlp_stream_kernel(x_ref, w_in_ref, b_in_ref, w_hk_ref, b_hk_ref,
                       w_out_ref, b_out_ref, o_ref, h_ref):
    """Layer-streaming path: grid=(batch_tiles, L); one hidden-layer weight
    block (1, N, N) is DMA'd per step, activations carried in VMEM scratch."""
    k = pl.program_id(1)

    @pl.when(k == 0)
    def _():
        h0 = jnp.dot(x_ref[...], w_in_ref[...],
                     preferred_element_type=jnp.float32)
        h_ref[...] = jnp.maximum(h0 + b_in_ref[...], 0.0)

    hk = jnp.dot(h_ref[...].astype(w_hk_ref.dtype), w_hk_ref[0],
                 preferred_element_type=jnp.float32)
    h_ref[...] = jnp.maximum(hk + b_hk_ref[0], 0.0)

    @pl.when(k == pl.num_programs(1) - 1)
    def _():
        out = jnp.dot(h_ref[...].astype(w_out_ref.dtype), w_out_ref[...],
                      preferred_element_type=jnp.float32)
        o_ref[...] = (out + b_out_ref[...]).astype(o_ref.dtype)


# ----------------------------------------------------------------------------
# Wrapper
# ----------------------------------------------------------------------------
def prepare_params(params):
    """One-time prep: bf16 weight copies, f32 biases, lane-padded output layer.
    Done once so the per-call graph only contains the pallas_call."""
    neurons = params["w_in"].shape[1]
    out_dim = params["w_out"].shape[1]
    out_p = _round_up(out_dim, _LANE)

    w_out = params["w_out"].astype(jnp.bfloat16)
    b_out = params["b_out"].astype(jnp.float32)
    if out_p != out_dim:
        w_out = jnp.pad(w_out, ((0, 0), (0, out_p - out_dim)))
        b_out = jnp.pad(b_out, ((0, 0), (0, out_p - out_dim)))

    w_h = params["w_h"].astype(jnp.bfloat16)
    b_h = params["b_h"].astype(jnp.float32)
    if w_h.shape[0] == 0:  # n_hidden_layers == 0: keep a dummy block for specs
        w_h = jnp.zeros((1, neurons, neurons), jnp.bfloat16)
        b_h = jnp.zeros((1, 1, neurons), jnp.float32)

    prepped = dict(
        w_in=params["w_in"].astype(jnp.bfloat16),
        b_in=params["b_in"].astype(jnp.float32),
        w_h=w_h, b_h=b_h, w_out=w_out, b_out=b_out,
        out_dim=out_dim,
    )
    # Materialize now (cast/pad work happens once, not per forward call).
    return {k: (jax.block_until_ready(v) if isinstance(v, jax.Array) else v)
            for k, v in prepped.items()}


def _forward_impl(x, p, *, n_hidden_layers, force_stream, single_buffer_weights):
    batch, in_dim = x.shape
    neurons = p["w_in"].shape[1]
    out_p = p["w_out"].shape[1]
    out_dim = p["out_dim"]
    L_blocks = p["w_h"].shape[0]

    kind, vmem_cap = _tpu_generation_info()
    is_v5 = "v5" in kind
    is_v7 = "v7" in kind

    # --- Generation-aware batch tile (multiple of 16 for bf16 packing).
    tm_pref = 128 if is_v5 else 256
    tm = min(tm_pref, _round_up(batch, 16))
    batch_p = _round_up(batch, tm)
    # v7x has two TensorCores: make sure the "parallel" axis has >= 2 tiles.
    if is_v7 and (batch_p // tm) < 2 and tm > 128 and batch > 128:
        tm = 128
        batch_p = _round_up(batch, tm)

    x_bf = x.astype(jnp.bfloat16)
    if batch_p != batch:
        x_bf = jnp.pad(x_bf, ((0, batch_p - batch), (0, 0)))

    # --- VMEM budget: ~20% headroom below physical per-core VMEM.
    vmem_limit = int(vmem_cap * 0.8)

    # --- Resident vs layer-streaming decision.
    resident_weight_bytes = 2 * (in_dim * neurons
                                 + L_blocks * neurons * neurons
                                 + neurons * out_p)
    act_bytes = tm * neurons * 8 + tm * (in_dim + out_p) * 8
    use_streaming = force_stream or (
        n_hidden_layers >= 1
        and resident_weight_bytes + act_bytes > vmem_limit // 2)

    flops = 2 * batch_p * (in_dim * neurons
                           + n_hidden_layers * neurons * neurons
                           + neurons * out_p)
    bytes_accessed = (x_bf.size * 2 + p["w_in"].size * 2 + p["w_h"].size * 2
                      + p["w_out"].size * 2 + p["b_in"].size * 4
                      + p["b_h"].size * 4 + p["b_out"].size * 4
                      + batch_p * out_p * 4)
    cost = pl.CostEstimate(flops=flops, transcendentals=0,
                           bytes_accessed=bytes_accessed)

    def resident_spec(shape, index_map):
        # Constant-index (VMEM-resident) blocks: single-buffer them so the
        # default 2-deep pipelining doesn't double their VMEM footprint.
        if single_buffer_weights:
            return pl.BlockSpec(shape, index_map, pipeline_mode=pl.Buffered(1))
        return pl.BlockSpec(shape, index_map)

    if not use_streaming:
        grid = (batch_p // tm,)
        kernel = functools.partial(_mlp_resident_kernel,
                                   n_hidden_layers=n_hidden_layers)
        in_specs = [
            pl.BlockSpec((tm, in_dim), lambda i: (i, 0)),                  # x
            resident_spec((in_dim, neurons), lambda i: (0, 0)),            # w_in
            resident_spec((1, neurons), lambda i: (0, 0)),                 # b_in
            resident_spec((L_blocks, neurons, neurons), lambda i: (0, 0, 0)),
            resident_spec((L_blocks, 1, neurons), lambda i: (0, 0, 0)),
            resident_spec((neurons, out_p), lambda i: (0, 0)),             # w_out
            resident_spec((1, out_p), lambda i: (0, 0)),                   # b_out
        ]
        out_spec = pl.BlockSpec((tm, out_p), lambda i: (i, 0))
        scratch = []
        dims = ("parallel",)
    else:
        grid = (batch_p // tm, n_hidden_layers)
        kernel = _mlp_stream_kernel
        in_specs = [
            pl.BlockSpec((tm, in_dim), lambda i, k: (i, 0)),               # x
            resident_spec((in_dim, neurons), lambda i, k: (0, 0)),         # w_in
            resident_spec((1, neurons), lambda i, k: (0, 0)),              # b_in
            pl.BlockSpec((1, neurons, neurons), lambda i, k: (k, 0, 0)),   # w_h[k]
            pl.BlockSpec((1, 1, neurons), lambda i, k: (k, 0, 0)),         # b_h[k]
            resident_spec((neurons, out_p), lambda i, k: (0, 0)),          # w_out
            resident_spec((1, out_p), lambda i, k: (0, 0)),                # b_out
        ]
        out_spec = pl.BlockSpec((tm, out_p), lambda i, k: (i, 0))
        scratch = [pltpu.VMEM((tm, neurons), jnp.float32)]
        dims = ("parallel", "arbitrary")

    out_padded = pl.pallas_call(
        kernel,
        out_shape=jax.ShapeDtypeStruct((batch_p, out_p), jnp.float32),
        grid=grid,
        in_specs=in_specs,
        out_specs=out_spec,
        scratch_shapes=scratch,
        compiler_params=pltpu.CompilerParams(
            dimension_semantics=dims,
            vmem_limit_bytes=vmem_limit,
        ),
        cost_estimate=cost,
    )(x_bf, p["w_in"], p["b_in"], p["w_h"], p["b_h"], p["w_out"], p["b_out"])

    return out_padded[:batch, :out_dim]


def network1_forward(x, prepared_params, *, n_hidden_layers, force_stream=False):
    """x: (batch, input_dimension) float32. prepared_params: from prepare_params."""
    try:
        out = _forward_impl(x, prepared_params, n_hidden_layers=n_hidden_layers,
                            force_stream=force_stream, single_buffer_weights=True)
        return jax.block_until_ready(out)
    except Exception:
        # Fallback if this JAX/Mosaic build rejects pipeline_mode=pl.Buffered(1).
        out = _forward_impl(x, prepared_params, n_hidden_layers=n_hidden_layers,
                            force_stream=force_stream, single_buffer_weights=False)
        return jax.block_until_ready(out)


# ----------------------------------------------------------------------------
# Init + pure-JAX reference
# ----------------------------------------------------------------------------
def init_params(key, input_dimension, output_dimension, n_hidden_layers, neurons):
    """Deterministic synthetic init. Weights stored as (in_features, out_features)
    (i.e. already transposed relative to PyTorch's nn.Linear (out, in))."""
    ks = jax.random.split(key, 6)
    scale = 0.1
    w_in = scale * jax.random.normal(ks[0], (input_dimension, neurons), jnp.float32)
    b_in = scale * jax.random.normal(ks[1], (1, neurons), jnp.float32)
    w_h = scale * jax.random.normal(ks[2], (n_hidden_layers, neurons, neurons), jnp.float32)
    b_h = scale * jax.random.normal(ks[3], (n_hidden_layers, 1, neurons), jnp.float32)
    w_out = scale * jax.random.normal(ks[4], (neurons, output_dimension), jnp.float32)
    b_out = scale * jax.random.normal(ks[5], (1, output_dimension), jnp.float32)
    return dict(w_in=w_in, b_in=b_in, w_h=w_h, b_h=b_h, w_out=w_out, b_out=b_out)


def reference_forward(x, params, *, n_hidden_layers):
    """Pure-JAX f32 reference mirroring the PyTorch forward (dropout p=0)."""
    h = jnp.maximum(x @ params["w_in"] + params["b_in"], 0.0)
    for k in range(n_hidden_layers):
        h = jnp.maximum(h @ params["w_h"][k] + params["b_h"][k], 0.0)
    return h @ params["w_out"] + params["b_out"]


if __name__ == "__main__":
    # Small shapes consistent with the module's forward.
    batch = 8
    input_dimension = 16
    output_dimension = 8
    n_hidden_layers = 2
    neurons = 128

    key = jax.random.PRNGKey(0)
    k_x, k_p = jax.random.split(key)
    x = jax.random.normal(k_x, (batch, input_dimension), jnp.float32)
    params = init_params(k_p, input_dimension, output_dimension,
                         n_hidden_layers, neurons)
    prepared = prepare_params(params)

    ref = reference_forward(x, params, n_hidden_layers=n_hidden_layers)

    # 1) Fused, VMEM-resident-weight path.
    out = network1_forward(x, prepared, n_hidden_layers=n_hidden_layers)
    assert out.shape == (batch, output_dimension)
    assert jnp.allclose(out, ref, atol=5e-2, rtol=5e-2), \
        f"resident path max abs err {jnp.max(jnp.abs(out - ref))}"

    # 2) Layer-streaming path (used automatically for large L*N^2 weight
    #    stacks); exercised here explicitly to validate it.
    out_s = network1_forward(x, prepared, n_hidden_layers=n_hidden_layers,
                             force_stream=True)
    assert out_s.shape == (batch, output_dimension)
    assert jnp.allclose(out_s, ref, atol=5e-2, rtol=5e-2), \
        f"streaming path max abs err {jnp.max(jnp.abs(out_s - ref))}"

    print("KERNEL_OK")
</pallas_src>

<mosaic_0001>
module attributes {stable_mosaic.version = 11 : i64} {
  func.func @_mlp_resident_kernel(%arg0: i32, %arg1: memref<16x16xbf16, #tpu.memory_space<vmem>>, %arg2: memref<16x128xbf16, #tpu.memory_space<vmem>>, %arg3: memref<1x128xf32, #tpu.memory_space<vmem>>, %arg4: memref<2x128x128xbf16, #tpu.memory_space<vmem>>, %arg5: memref<2x1x128xf32, #tpu.memory_space<vmem>>, %arg6: memref<128x128xbf16, #tpu.memory_space<vmem>>, %arg7: memref<1x128xf32, #tpu.memory_space<vmem>>, %arg8: memref<16x128xf32, #tpu.memory_space<vmem>>) attributes {dimension_semantics = [#tpu.dimension_semantics<parallel>], iteration_bounds = array<i64: 1>, scalar_prefetch = 0 : i64, scratch_operands = 0 : i64, tpu.core_type = #tpu.core_type<tc>, window_params = [{transform_indices = @transform_0, window_bounds = array<i64: 16, 16>}, {pipeline_mode = #tpu.pipeline_mode<synchronous>, transform_indices = @transform_1, window_bounds = array<i64: 16, 128>}, {pipeline_mode = #tpu.pipeline_mode<synchronous>, transform_indices = @transform_2, window_bounds = array<i64: 1, 128>}, {pipeline_mode = #tpu.pipeline_mode<synchronous>, transform_indices = @transform_3, window_bounds = array<i64: 2, 128, 128>}, {pipeline_mode = #tpu.pipeline_mode<synchronous>, transform_indices = @transform_4, window_bounds = array<i64: 2, 1, 128>}, {pipeline_mode = #tpu.pipeline_mode<synchronous>, transform_indices = @transform_5, window_bounds = array<i64: 128, 128>}, {pipeline_mode = #tpu.pipeline_mode<synchronous>, transform_indices = @transform_6, window_bounds = array<i64: 1, 128>}, {transform_indices = @transform_7, window_bounds = array<i64: 16, 128>}]} {
    %c0 = arith.constant 0 : index
    %c0_0 = arith.constant 0 : index
    %0 = vector.load %arg1[%c0, %c0_0] : memref<16x16xbf16, #tpu.memory_space<vmem>>, vector<16x16xbf16>
    %c0_1 = arith.constant 0 : index
    %c0_2 = arith.constant 0 : index
    %1 = vector.load %arg2[%c0_1, %c0_2] : memref<16x128xbf16, #tpu.memory_space<vmem>>, vector<16x128xbf16>
    %cst = arith.constant dense<0.000000e+00> : vector<16x128xf32>
    %2 = tpu.matmul %0, %1, %cst {dimension_numbers = #tpu.dot_dimension_numbers<[1], [0], [0], [1], [0, 0, 1, 1], [], []>} : vector<16x16xbf16>, vector<16x128xbf16>, vector<16x128xf32> -> vector<16x128xf32>
    %c0_3 = arith.constant 0 : index
    %c0_4 = arith.constant 0 : index
    %3 = vector.load %arg3[%c0_3, %c0_4] : memref<1x128xf32, #tpu.memory_space<vmem>>, vector<1x128xf32>
    %4 = vector.broadcast %3 : vector<1x128xf32> to vector<16x128xf32>
    %5 = arith.addf %2, %4 : vector<16x128xf32>
    %cst_5 = arith.constant 0.000000e+00 : f32
    %6 = vector.broadcast %cst_5 : f32 to vector<16x128xf32>
    %7 = arith.maximumf %5, %6 : vector<16x128xf32>
    %c0_i32 = arith.constant 0 : i32
    %8 = arith.truncf %7 : vector<16x128xf32> to vector<16x128xbf16>
    %9 = arith.index_cast %c0_i32 : i32 to index
    %c0_6 = arith.constant 0 : index
    %c0_7 = arith.constant 0 : index
    %10 = vector.load %arg4[%9, %c0_6, %c0_7] : memref<2x128x128xbf16, #tpu.memory_space<vmem>>, vector<1x128x128xbf16>
    %11 = vector.shape_cast %10 : vector<1x128x128xbf16> to vector<128x128xbf16>
    %cst_8 = arith.constant dense<0.000000e+00> : vector<16x128xf32>
    %12 = tpu.matmul %8, %11, %cst_8 {dimension_numbers = #tpu.dot_dimension_numbers<[1], [0], [0], [1], [0, 0, 1, 1], [], []>} : vector<16x128xbf16>, vector<128x128xbf16>, vector<16x128xf32> -> vector<16x128xf32>
    %13 = arith.index_cast %c0_i32 : i32 to index
    %c0_9 = arith.constant 0 : index
    %c0_10 = arith.constant 0 : index
    %14 = vector.load %arg5[%13, %c0_9, %c0_10] : memref<2x1x128xf32, #tpu.memory_space<vmem>>, vector<1x1x128xf32>
    %15 = vector.shape_cast %14 : vector<1x1x128xf32> to vector<1x128xf32>
    %16 = vector.broadcast %15 : vector<1x128xf32> to vector<16x128xf32>
    %17 = arith.addf %12, %16 : vector<16x128xf32>
    %cst_11 = arith.constant 0.000000e+00 : f32
    %18 = vector.broadcast %cst_11 : f32 to vector<16x128xf32>
    %19 = arith.maximumf %17, %18 : vector<16x128xf32>
    %c1_i32 = arith.constant 1 : i32
    %20 = arith.truncf %19 : vector<16x128xf32> to vector<16x128xbf16>
    %21 = arith.index_cast %c1_i32 : i32 to index
    %c0_12 = arith.constant 0 : index
    %c0_13 = arith.constant 0 : index
    %22 = vector.load %arg4[%21, %c0_12, %c0_13] : memref<2x128x128xbf16, #tpu.memory_space<vmem>>, vector<1x128x128xbf16>
    %23 = vector.shape_cast %22 : vector<1x128x128xbf16> to vector<128x128xbf16>
    %cst_14 = arith.constant dense<0.000000e+00> : vector<16x128xf32>
    %24 = tpu.matmul %20, %23, %cst_14 {dimension_numbers = #tpu.dot_dimension_numbers<[1], [0], [0], [1], [0, 0, 1, 1], [], []>} : vector<16x128xbf16>, vector<128x128xbf16>, vector<16x128xf32> -> vector<16x128xf32>
    %25 = arith.index_cast %c1_i32 : i32 to index
    %c0_15 = arith.constant 0 : index
    %c0_16 = arith.constant 0 : index
    %26 = vector.load %arg5[%25, %c0_15, %c0_16] : memref<2x1x128xf32, #tpu.memory_space<vmem>>, vector<1x1x128xf32>
    %27 = vector.shape_cast %26 : vector<1x1x128xf32> to vector<1x128xf32>
    %28 = vector.broadcast %27 : vector<1x128xf32> to vector<16x128xf32>
    %29 = arith.addf %24, %28 : vector<16x128xf32>
    %cst_17 = arith.constant 0.000000e+00 : f32
    %30 = vector.broadcast %cst_17 : f32 to vector<16x128xf32>
    %31 = arith.maximumf %29, %30 : vector<16x128xf32>
    %c2_i32 = arith.constant 2 : i32
    %32 = arith.truncf %31 : vector<16x128xf32> to vector<16x128xbf16>
    %c0_18 = arith.constant 0 : index
    %c0_19 = arith.constant 0 : index
    %33 = vector.load %arg6[%c0_18, %c0_19] : memref<128x128xbf16, #tpu.memory_space<vmem>>, vector<128x128xbf16>
    %cst_20 = arith.constant dense<0.000000e+00> : vector<16x128xf32>
    %34 = tpu.matmul %32, %33, %cst_20 {dimension_numbers = #tpu.dot_dimension_numbers<[1], [0], [0], [1], [0, 0, 1, 1], [], []>} : vector<16x128xbf16>, vector<128x128xbf16>, vector<16x128xf32> -> vector<16x128xf32>
    %c0_21 = arith.constant 0 : index
    %c0_22 = arith.constant 0 : index
    %35 = vector.load %arg7[%c0_21, %c0_22] : memref<1x128xf32, #tpu.memory_space<vmem>>, vector<1x128xf32>
    %36 = vector.broadcast %35 : vector<1x128xf32> to vector<16x128xf32>
    %37 = arith.addf %34, %36 : vector<16x128xf32>
    %c0_23 = arith.constant 0 : index
    %c0_24 = arith.constant 0 : index
    %38 = vector.load %arg8[%c0_23, %c0_24] : memref<16x128xf32, #tpu.memory_space<vmem>>, vector<16x128xf32>
    tpu.vector_store %arg8[%c0_23, %c0_24], %37 {strides = array<i32>} : memref<16x128xf32, #tpu.memory_space<vmem>>, vector<16x128xf32>,
    return
  }
  func.func @transform_0(%arg0: i32) -> (i32, i32) {
    %c0_i32 = arith.constant 0 : i32
    %c0_i32_0 = arith.constant 0 : i32
    return %arg0, %c0_i32 : i32, i32
  }
  func.func @transform_1(%arg0: i32) -> (i32, i32) {
    %c0_i32 = arith.constant 0 : i32
    %c0_i32_0 = arith.constant 0 : i32
    %c0_i32_1 = arith.constant 0 : i32
    return %c0_i32, %c0_i32_0 : i32, i32
  }
  func.func @transform_2(%arg0: i32) -> (i32, i32) {
    %c0_i32 = arith.constant 0 : i32
    %c0_i32_0 = arith.constant 0 : i32
    %c0_i32_1 = arith.constant 0 : i32
    return %c0_i32, %c0_i32_0 : i32, i32
  }
  func.func @transform_3(%arg0: i32) -> (i32, i32, i32) {
    %c0_i32 = arith.constant 0 : i32
    %c0_i32_0 = arith.constant 0 : i32
    %c0_i32_1 = arith.constant 0 : i32
    %c0_i32_2 = arith.constant 0 : i32
    return %c0_i32, %c0_i32_0, %c0_i32_1 : i32, i32, i32
  }
  func.func @transform_4(%arg0: i32) -> (i32, i32, i32) {
    %c0_i32 = arith.constant 0 : i32
    %c0_i32_0 = arith.constant 0 : i32
    %c0_i32_1 = arith.constant 0 : i32
    %c0_i32_2 = arith.constant 0 : i32
    return %c0_i32, %c0_i32_0, %c0_i32_1 : i32, i32, i32
  }
  func.func @transform_5(%arg0: i32) -> (i32, i32) {
    %c0_i32 = arith.constant 0 : i32
    %c0_i32_0 = arith.constant 0 : i32
    %c0_i32_1 = arith.constant 0 : i32
    return %c0_i32, %c0_i32_0 : i32, i32
  }
  func.func @transform_6(%arg0: i32) -> (i32, i32) {
    %c0_i32 = arith.constant 0 : i32
    %c0_i32_0 = arith.constant 0 : i32
    %c0_i32_1 = arith.constant 0 : i32
    return %c0_i32, %c0_i32_0 : i32, i32
  }
  func.func @transform_7(%arg0: i32) -> (i32, i32) {
    %c0_i32 = arith.constant 0 : i32
    %c0_i32_0 = arith.constant 0 : i32
    return %arg0, %c0_i32 : i32, i32
  }
}

module attributes {stable_mosaic.version = 11 : i64} {
  func.func @_mlp_resident_kernel(%arg0: i32, %arg1: memref<16x16xbf16, #tpu.memory_space<vmem>>, %arg2: memref<16x128xbf16, #tpu.memory_space<vmem>>, %arg3: memref<1x128xf32, #tpu.memory_space<vmem>>, %arg4: memref<2x128x128xbf16, #tpu.memory_space<vmem>>, %arg5: memref<2x1x128xf32, #tpu.memory_space<vmem>>, %arg6: memref<128x128xbf16, #tpu.memory_space<vmem>>, %arg7: memref<1x128xf32, #tpu.memory_space<vmem>>, %arg8: memref<16x128xf32, #tpu.memory_space<vmem>>) attributes {dimension_semantics = [#tpu.dimension_semantics<parallel>], iteration_bounds = array<i64: 1>, scalar_prefetch = 0 : i64, scratch_operands = 0 : i64, tpu.core_type = #tpu.core_type<tc>, window_params = [{transform_indices = @transform_0, window_bounds = array<i64: 16, 16>}, {pipeline_mode = #tpu.pipeline_mode<synchronous>, transform_indices = @transform_1, window_bounds = array<i64: 16, 128>}, {pipeline_mode = #tpu.pipeline_mode<synchronous>, transform_indices = @transform_2, window_bounds = array<i64: 1, 128>}, {pipeline_mode = #tpu.pipeline_mode<synchronous>, transform_indices = @transform_3, window_bounds = array<i64: 2, 128, 128>}, {pipeline_mode = #tpu.pipeline_mode<synchronous>, transform_indices = @transform_4, window_bounds = array<i64: 2, 1, 128>}, {pipeline_mode = #tpu.pipeline_mode<synchronous>, transform_indices = @transform_5, window_bounds = array<i64: 128, 128>}, {pipeline_mode = #tpu.pipeline_mode<synchronous>, transform_indices = @transform_6, window_bounds = array<i64: 1, 128>}, {transform_indices = @transform_7, window_bounds = array<i64: 16, 128>}]} {
    %c0 = arith.constant 0 : index
    %c0_0 = arith.constant 0 : index
    %0 = vector.load %arg1[%c0, %c0_0] : memref<16x16xbf16, #tpu.memory_space<vmem>>, vector<16x16xbf16>
    %c0_1 = arith.constant 0 : index
    %c0_2 = arith.constant 0 : index
    %1 = vector.load %arg2[%c0_1, %c0_2] : memref<16x128xbf16, #tpu.memory_space<vmem>>, vector<16x128xbf16>
    %cst = arith.constant dense<0.000000e+00> : vector<16x128xf32>
    %2 = tpu.matmul %0, %1, %cst {dimension_numbers = #tpu.dot_dimension_numbers<[1], [0], [0], [1], [0, 0, 1, 1], [], []>} : vector<16x16xbf16>, vector<16x128xbf16>, vector<16x128xf32> -> vector<16x128xf32>
    %c0_3 = arith.constant 0 : index
    %c0_4 = arith.constant 0 : index
    %3 = vector.load %arg3[%c0_3, %c0_4] : memref<1x128xf32, #tpu.memory_space<vmem>>, vector<1x128xf32>
    %4 = vector.broadcast %3 : vector<1x128xf32> to vector<16x128xf32>
    %5 = arith.addf %2, %4 : vector<16x128xf32>
    %cst_5 = arith.constant 0.000000e+00 : f32
    %6 = vector.broadcast %cst_5 : f32 to vector<16x128xf32>
    %7 = arith.maximumf %5, %6 : vector<16x128xf32>
    %c0_i32 = arith.constant 0 : i32
    %8 = arith.truncf %7 : vector<16x128xf32> to vector<16x128xbf16>
    %9 = arith.index_cast %c0_i32 : i32 to index
    %c0_6 = arith.constant 0 : index
    %c0_7 = arith.constant 0 : index
    %10 = vector.load %arg4[%9, %c0_6, %c0_7] : memref<2x128x128xbf16, #tpu.memory_space<vmem>>, vector<1x128x128xbf16>
    %11 = vector.shape_cast %10 : vector<1x128x128xbf16> to vector<128x128xbf16>
    %cst_8 = arith.constant dense<0.000000e+00> : vector<16x128xf32>
    %12 = tpu.matmul %8, %11, %cst_8 {dimension_numbers = #tpu.dot_dimension_numbers<[1], [0], [0], [1], [0, 0, 1, 1], [], []>} : vector<16x128xbf16>, vector<128x128xbf16>, vector<16x128xf32> -> vector<16x128xf32>
    %13 = arith.index_cast %c0_i32 : i32 to index
    %c0_9 = arith.constant 0 : index
    %c0_10 = arith.constant 0 : index
    %14 = vector.load %arg5[%13, %c0_9, %c0_10] : memref<2x1x128xf32, #tpu.memory_space<vmem>>, vector<1x1x128xf32>
    %15 = vector.shape_cast %14 : vector<1x1x128xf32> to vector<1x128xf32>
    %16 = vector.broadcast %15 : vector<1x128xf32> to vector<16x128xf32>
    %17 = arith.addf %12, %16 : vector<16x128xf32>
    %cst_11 = arith.constant 0.000000e+00 : f32
    %18 = vector.broadcast %cst_11 : f32 to vector<16x128xf32>
    %19 = arith.maximumf %17, %18 : vector<16x128xf32>
    %c1_i32 = arith.constant 1 : i32
    %20 = arith.truncf %19 : vector<16x128xf32> to vector<16x128xbf16>
    %21 = arith.index_cast %c1_i32 : i32 to index
    %c0_12 = arith.constant 0 : index
    %c0_13 = arith.constant 0 : index
    %22 = vector.load %arg4[%21, %c0_12, %c0_13] : memref<2x128x128xbf16, #tpu.memory_space<vmem>>, vector<1x128x128xbf16>
    %23 = vector.shape_cast %22 : vector<1x128x128xbf16> to vector<128x128xbf16>
    %cst_14 = arith.constant dense<0.000000e+00> : vector<16x128xf32>
    %24 = tpu.matmul %20, %23, %cst_14 {dimension_numbers = #tpu.dot_dimension_numbers<[1], [0], [0], [1], [0, 0, 1, 1], [], []>} : vector<16x128xbf16>, vector<128x128xbf16>, vector<16x128xf32> -> vector<16x128xf32>
    %25 = arith.index_cast %c1_i32 : i32 to index
    %c0_15 = arith.constant 0 : index
    %c0_16 = arith.constant 0 : index
    %26 = vector.load %arg5[%25, %c0_15, %c0_16] : memref<2x1x128xf32, #tpu.memory_space<vmem>>, vector<1x1x128xf32>
    %27 = vector.shape_cast %26 : vector<1x1x128xf32> to vector<1x128xf32>
    %28 = vector.broadcast %27 : vector<1x128xf32> to vector<16x128xf32>
    %29 = arith.addf %24, %28 : vector<16x128xf32>
    %cst_17 = arith.constant 0.000000e+00 : f32
    %30 = vector.broadcast %cst_17 : f32 to vector<16x128xf32>
    %31 = arith.maximumf %29, %30 : vector<16x128xf32>
    %c2_i32 = arith.constant 2 : i32
    %32 = arith.truncf %31 : vector<16x128xf32> to vector<16x128xbf16>
    %c0_18 = arith.constant 0 : index
    %c0_19 = arith.constant 0 : index
    %33 = vector.load %arg6[%c0_18, %c0_19] : memref<128x128xbf16, #tpu.memory_space<vmem>>, vector<128x128xbf16>
    %cst_20 = arith.constant dense<0.000000e+00> : vector<16x128xf32>
    %34 = tpu.matmul %32, %33, %cst_20 {dimension_numbers = #tpu.dot_dimension_numbers<[1], [0], [0], [1], [0, 0, 1, 1], [], []>} : vector<16x128xbf16>, vector<128x128xbf16>, vector<16x128xf32> -> vector<16x128xf32>
    %c0_21 = arith.constant 0 : index
    %c0_22 = arith.constant 0 : index
    %35 = vector.load %arg7[%c0_21, %c0_22] : memref<1x128xf32, #tpu.memory_space<vmem>>, vector<1x128xf32>
    %36 = vector.broadcast %35 : vector<1x128xf32> to vector<16x128xf32>
    %37 = arith.addf %34, %36 : vector<16x128xf32>
    %c0_23 = arith.constant 0 : index
    %c0_24 = arith.constant 0 : index
    %38 = vector.load %arg8[%c0_23, %c0_24] : memref<16x128xf32, #tpu.memory_space<vmem>>, vector<16x128xf32>
    tpu.vector_store %arg8[%c0_23, %c0_24], %37 {strides = array<i32>} : memref<16x128xf32, #tpu.memory_space<vmem>>, vector<16x128xf32>,
    return
  }
  func.func @transform_0(%arg0: i32) -> (i32, i32) {
    %c0_i32 = arith.constant 0 : i32
    %c0_i32_0 = arith.constant 0 : i32
    return %arg0, %c0_i32 : i32, i32
  }
  func.func @transform_1(%arg0: i32) -> (i32, i32) {
    %c0_i32 = arith.constant 0 : i32
    %c0_i32_0 = arith.constant 0 : i32
    %c0_i32_1 = arith.constant 0 : i32
    return %c0_i32, %c0_i32_0 : i32, i32
  }
  func.func @transform_2(%arg0: i32) -> (i32, i32) {
    %c0_i32 = arith.constant 0 : i32
    %c0_i32_0 = arith.constant 0 : i32
    %c0_i32_1 = arith.constant 0 : i32
    return %c0_i32, %c0_i32_0 : i32, i32
  }
  func.func @transform_3(%arg0: i32) -> (i32, i32, i32) {
    %c0_i32 = arith.constant 0 : i32
    %c0_i32_0 = arith.constant 0 : i32
    %c0_i32_1 = arith.constant 0 : i32
    %c0_i32_2 = arith.constant 0 : i32
    return %c0_i32, %c0_i32_0, %c0_i32_1 : i32, i32, i32
  }
  func.func @transform_4(%arg0: i32) -> (i32, i32, i32) {
    %c0_i32 = arith.constant 0 : i32
    %c0_i32_0 = arith.constant 0 : i32
    %c0_i32_1 = arith.constant 0 : i32
    %c0_i32_2 = arith.constant 0 : i32
    return %c0_i32, %c0_i32_0, %c0_i32_1 : i32, i32, i32
  }
  func.func @transform_5(%arg0: i32) -> (i32, i32) {
    %c0_i32 = arith.constant 0 : i32
    %c0_i32_0 = arith.constant 0 : i32
    %c0_i32_1 = arith.constant 0 : i32
    return %c0_i32, %c0_i32_0 : i32, i32
  }
  func.func @transform_6(%arg0: i32) -> (i32, i32) {
    %c0_i32 = arith.constant 0 : i32
    %c0_i32_0 = arith.constant 0 : i32
    %c0_i32_1 = arith.constant 0 : i32
    return %c0_i32, %c0_i32_0 : i32, i32
  }
  func.func @transform_7(%arg0: i32) -> (i32, i32) {
    %c0_i32 = arith.constant 0 : i32
    %c0_i32_0 = arith.constant 0 : i32
    return %arg0, %c0_i32 : i32, i32
  }
}

</mosaic_0001>

<bundles_post_ra>
// kernel: tpu_custom_call.1
= control target key start
LH: loop header
LB: loop body
LE: loop exit
PB: predicated region body
PF: predicated region fallthrough
CT: control target
= control target key end

     0   :  { %12 = vsyncpa [#allocation3], 0  ;;  %s913_s0 = inlined_call_operand.hbm [shape: bf16[16,16], index: 0, kind: input, shape index: {}]   ;;  %s914_s1 = inlined_call_operand.hbm [shape: bf16[16,128], index: 1, kind: input, shape index: {}]   ;;  %s915_s2 = inlined_call_operand.vmem [shape: f32[1,128], index: 2, kind: input, shape index: {}]   ;;  %s916_s3 = inlined_call_operand.hbm [shape: bf16[2,128,128], index: 3, kind: input, shape index: {}]   ;;  %s917_s4 = inlined_call_operand.vmem [shape: f32[2,1,128], index: 4, kind: input, shape index: {}]   ;;  %s918_s5 = inlined_call_operand.hbm [shape: bf16[128,128], index: 5, kind: input, shape index: {}]   ;;  %s919_s6 = inlined_call_operand.vmem [shape: f32[1,128], index: 6, kind: input, shape index: {}]   ;;  %s920_s7 = inlined_call_operand.hbm [shape: f32[16,128], index: 7, kind: output, shape index: {}]  }
   0x1   :  { %13 = vsyncpa [#allocation6], 0 }
   0x2   :  { %14 = vsyncpa [#allocation9], 0 }
   0x3   :  { %15 = vsyncpa [#allocation4], 0  ;;  %s790_s24 = smov [#allocation5]   ;;  %s791_s26 = smov [#allocation2]  }
   0x4   :  { %s33_s25 = sshll.u32 %s790_s24, 4  ;;  %s21_s27 = sshll.u32 %s791_s26, 4  ;;  %s34_s25 = int_to_ptr.vmem [resolvable:$true] %s33_s25  ;;  %s22_s27 = int_to_ptr.vmem [resolvable:$true] %s21_s27 }
   0x5   :  { %s690_s28 = scalar_lea.vmem %s34_s25, 128  ;;  %p695_p1 = scmp.lt.s32.totalorder %s34_s25, %s34_s25 }
   0x6   :  { %p691_p0 = scmp.ne.s32.totalorder %s34_s25, %s690_s28  ;;  %p696_p2 = scmp.lt.s32.totalorder %s690_s28, %s690_s28 }
   0x8   :  { %p697_p3 = por %p696_p2, %p695_p1 }
   0xa   :  { %p698_p4 = pnand %p697_p3, %p691_p0 }
   0xc   :  { %701 = shalt.err (!%p698_p4)
}
   0xd   :  { %s792_s29 = smov 64   ;;  %s793_s30 = smov 4  }
   0xe   :  { %39 = dma.hbm_to_vmem [thread:$0]  %s914_s1, 128, %s34_s25, [#allocation6], %s792_s29, %s792_s29, %s793_s30  }
   0xf   :  { %s710_s10 = scalar_lea.vmem %s22_s27, 128  ;;  %p715_p6 = scmp.lt.s32.totalorder %s22_s27, %s22_s27 }
  0x10   :  { %p711_p5 = scmp.ne.s32.totalorder %s22_s27, %s710_s10  ;;  %p716_p7 = scmp.lt.s32.totalorder %s710_s10, %s710_s10 }
  0x12   :  { %p717_p8 = por %p716_p7, %p715_p6 }
  0x14   :  { %p718_p9 = pnand %p717_p8, %p711_p5 }
  0x16   :  { %721 = shalt.err (!%p718_p9)
}
  0x17   :  { %27 = dma.hbm_to_vmem [thread:$0]  %s913_s0, 128, %s22_s27, [#allocation3], %s792_s29, %s792_s29, %s793_s30  }
  0x18   :  { %s794_s13 = smov [#allocation7]   ;;  %s795_s15 = smov [#allocation8]  }
  0x19   :  { %s47_s14 = sshll.u32 %s794_s13, 4  ;;  %s61_s16 = sshll.u32 %s795_s15, 4  ;;  %s48_s14 = int_to_ptr.vmem [resolvable:$true] %s47_s14  ;;  %s62_s16 = int_to_ptr.vmem [resolvable:$true] %s61_s16 }
  0x1a   :  { %s730_s1 = scalar_lea.vmem %s48_s14, 2048  ;;  %p735_p11 = scmp.lt.s32.totalorder %s48_s14, %s48_s14 }
  0x1b   :  { %p731_p10 = scmp.ne.s32.totalorder %s48_s14, %s730_s1  ;;  %p736_p12 = scmp.lt.s32.totalorder %s730_s1, %s730_s1 }
  0x1d   :  { %p737_p13 = por %p736_p12, %p735_p11 }
  0x1f   :  { %p738_p0 = pnand %p737_p13, %p731_p10 }
  0x21   :  { %741 = shalt.err (!%p738_p0)
}
  0x22   :  { %53 = dma.hbm_to_vmem [thread:$0]  %s916_s3, 2048, %s48_s14, [#allocation6], %s792_s29, %s792_s29, %s793_s30  }
  0x23   :  { %s750_s0 = scalar_lea.vmem %s62_s16, 1024  ;;  %p755_p2 = scmp.lt.s32.totalorder %s62_s16, %s62_s16 }
  0x24   :  { %p751_p1 = scmp.ne.s32.totalorder %s62_s16, %s750_s0  ;;  %p756_p3 = scmp.lt.s32.totalorder %s750_s0, %s750_s0 }
  0x26   :  { %p757_p4 = por %p756_p3, %p755_p2 }
  0x28   :  { %p758_p5 = pnand %p757_p4, %p751_p1 }
  0x2a   :  { %761 = shalt.err (!%p758_p5)
}
  0x2b   :  { %67 = dma.hbm_to_vmem [thread:$0]  %s918_s5, 1024, %s62_s16, [#allocation9], %s792_s29, %s792_s29, %s793_s30  }
  0x2c   :  { %782 = dma.done.wait [#allocation3], 128  }
  0x2d   :  { %783 = vsyncadd [#allocation3], 4294967168 }
  0x2e   :  { %784 = dma.done.wait [#allocation6], 2176  }
  0x2f   :  { %785 = vsyncadd [#allocation6], 4294965120 }
  0x30   :  { %786 = dma.done.wait [#allocation9], 1024  }
  0x31   :  { %787 = vsyncadd [#allocation9], 4294966272  ;;  %v796_v0 = vmov 0.0   ;;  %vm797_vm0 = vmmov 0   ;;  %v656_v1 = vld [vmem:[#allocation5] sm:$0xff]   ;;  %v657_v2 = vld [vmem:[#allocation2] sm:$0xff]  }
  0x32   :  { %579 = vmatprep.subr.bf16.mxu0 %v796_v0  ;;  %581 = vmatprep.mubr.msk.bf16.mxu0 %vm797_vm0, %v796_v0  ;;  %vm105_vm1 = vcmask 130048   ;;  %v658_v3 = vld [vmem:[#allocation7 + $0x38] sm:$0xff]   ;;  %v659_v4 = vld [vmem:[#allocation7 + $0x30] sm:$0xff]   ;;  %v660_v5 = vld [vmem:[#allocation7 + $0x28] sm:$0xff]   ;;  %s798_s26 = smov [#allocation10]  }
  0x33   :  { %585 = vmatprep.subr.bf16.mxu1 %v796_v0  ;;  %601 = vmatprep.mubr.msk.bf16.mxu1 %vm797_vm0, %v796_v0  ;;  %v661_v6 = vld [vmem:[#allocation7 + $0x20] sm:$0xff]   ;;  %v662_v7 = vld [vmem:[#allocation7 + $0x18] sm:$0xff]   ;;  %v663_v8 = vld [vmem:[#allocation7 + $0x10] sm:$0xff]   ;;  %s504_s27 = sshll.u32 %s798_s26, 4  ;;  %s505_s27 = int_to_ptr.vmem [resolvable:$true] %s504_s27 }
  0x34   :  { %580 = vmatpush3.bf16.msra.mxu0 %v656_v1  ;;  %586 = vmatpush3.bf16.msra.mxu1 %v658_v3  ;;  %v664_v9 = vld [vmem:[#allocation7 + $0x8] sm:$0xff]   ;;  %v665_v10 = vld [vmem:[#allocation7] sm:$0xff]   ;;  %v666_v11 = vld [vmem:[#allocation7 + $0x78] sm:$0xff]   ;;  %p767_p7 = scmp.lt.s32.totalorder %s505_s27, %s505_s27 }
  0x35   :  { %605 = vmatprep.subr.bf16.mxu0 %v796_v0  ;;  %587 = vmatprep.subr.bf16.mxu1 %v796_v0  ;;  %v667_v12 = vld [vmem:[#allocation7 + $0x70] sm:$0xff]   ;;  %v668_v13 = vld [vmem:[#allocation7 + $0x68] sm:$0xff]   ;;  %v669_v14 = vld [vmem:[#allocation7 + $0x60] sm:$0xff]  }
  0x36   :  { %v670_v15 = vld [vmem:[#allocation7 + $0x58] sm:$0xff]   ;;  %v518_v16 = vld [vmem:[%s915_s2] ss:$0 sm:$0xff]  ;;  %v672_v27 = vld [vmem:[#allocation7 + $0x48] sm:$0xff]  }
  0x37   :  { %582 = vmatmul.mubr.msk.bf16.vlgmr.msra.gmra.mxu0 %vm105_vm1, %v657_v2  ;;  %v671_v26 = vld [vmem:[#allocation7 + $0x50] sm:$0xff]   ;;  %v673_v28 = vld [vmem:[#allocation7 + $0x40] sm:$0xff]   ;;  %v674_v29 = vld [vmem:[#allocation8 + $0x38] sm:$0xff]  }
  0x38   :  { %621 = vmatprep.mubr.msk.bf16.mxu0 %vm797_vm0, %v796_v0  ;;  %588 = vmatpush3.bf16.msra.mxu1 %v659_v4  ;;  %v675_v30 = vld [vmem:[#allocation8 + $0x30] sm:$0xff]   ;;  %v676_v31 = vld [vmem:[#allocation8 + $0x28] sm:$0xff]   ;;  %v677_v32 = vld [vmem:[#allocation8 + $0x20] sm:$0xff]  }
  0x39   :  { %589 = vmatprep.subr.bf16.mxu1 %v796_v0  ;;  %606 = vmatpush3.bf16.msra.mxu0 %v666_v11  ;;  %v678_v33 = vld [vmem:[#allocation8 + $0x18] sm:$0xff]   ;;  %v522_v34 = vld [vmem:[%s917_s4] ss:$0 sm:$0xff]  ;;  %v680_v45 = vld [vmem:[#allocation8 + $0x8] sm:$0xff]  }
  0x3a   :  { %607 = vmatprep.subr.bf16.mxu0 %v796_v0  ;;  %v679_v44 = vld [vmem:[#allocation8 + $0x10] sm:$0xff]   ;;  %v681_v46 = vld [vmem:[#allocation8] sm:$0xff]  }
  0x3b   :  { %v532_v47 = vld [vmem:[%s917_s4 + $0x1] ss:$0 sm:$0xff]  ;;  %v541_v57 = vld [vmem:[%s919_s6] ss:$0 sm:$0xff]  ;;  %s762_s4 = scalar_lea.vmem %s505_s27, 256 }
  0x3c   :  { %590 = vmatpush3.bf16.msra.mxu1 %v660_v5  ;;  %p763_p6 = scmp.ne.s32.totalorder %s505_s27, %s762_s4  ;;  %p768_p8 = scmp.lt.s32.totalorder %s762_s4, %s762_s4 }
  0x3d   :  { %591 = vmatprep.subr.bf16.mxu1 %v796_v0  ;;  %608 = vmatpush3.bf16.msra.mxu0 %v667_v12 }
  0x3e   :  { %609 = vmatprep.subr.bf16.mxu0 %v796_v0  ;;  %p769_p9 = por %p768_p8, %p767_p7 }
  0x40   :  { %592 = vmatpush3.bf16.msra.mxu1 %v661_v6  ;;  %p770_p10 = pnand %p769_p9, %p763_p6 }
  0x41   :  { %593 = vmatprep.subr.bf16.mxu1 %v796_v0  ;;  %610 = vmatpush3.bf16.msra.mxu0 %v668_v13 }
  0x42   :  { %611 = vmatprep.subr.bf16.mxu0 %v796_v0 }
  0x44   :  { %594 = vmatpush3.bf16.msra.mxu1 %v662_v7 }
  0x45   :  { %595 = vmatprep.subr.bf16.mxu1 %v796_v0  ;;  %612 = vmatpush3.bf16.msra.mxu0 %v669_v14 }
  0x46   :  { %613 = vmatprep.subr.bf16.mxu0 %v796_v0 }
  0x48   :  { %596 = vmatpush3.bf16.msra.mxu1 %v663_v8 }
  0x49   :  { %597 = vmatprep.subr.bf16.mxu1 %v796_v0  ;;  %614 = vmatpush3.bf16.msra.mxu0 %v670_v15 }
  0x4a   :  { %615 = vmatprep.subr.bf16.mxu0 %v796_v0 }
  0x4c   :  { %598 = vmatpush3.bf16.msra.mxu1 %v664_v9 }
  0x4d   :  { %599 = vmatprep.subr.bf16.mxu1 %v796_v0  ;;  %616 = vmatpush3.bf16.msra.mxu0 %v671_v26 }
  0x4e   :  { %617 = vmatprep.subr.bf16.mxu0 %v796_v0 }
  0x50   :  { %600 = vmatpush3.bf16.msra.mxu1 %v665_v10 }
  0x51   :  { %625 = vmatprep.subr.bf16.mxu1 %v796_v0  ;;  %618 = vmatpush3.bf16.msra.mxu0 %v672_v27 }
  0x52   :  { %619 = vmatprep.subr.bf16.mxu0 %v796_v0 }
  0x55   :  { %620 = vmatpush3.bf16.msra.mxu0 %v673_v28 }
  0xf7   :  { %v143_v17 = vpop.f32.mrf.mxu0 }
  0xf8   :  { %v144_v19 = vadd.f32 %v518_v16, %v143_v17 }
  0xf9   :  { %v583_v18 = vpop.f32.mrf.mxu0 }
  0xfa   :  { %v150_v23 = vmax.f32 %v144_v19, 0.0 }
  0xfb   :  { %v146_v20 = vpop.f32.mrf.mxu0 }
  0xfc   :  { %v147_v21 = vadd.f32 %v518_v16, %v146_v20 }
  0xfd   :  { %v584_v22 = vpop.f32.mrf.mxu0 }
  0xfe   :  { %v151_v24 = vmax.f32 %v147_v21, 0.0 }
 0x100   :  { %v152_v25 = vpack.c.bf16 %v151_v24, %v150_v23 }
 0x102   :  { %602 = vmatmul.mubr.bf16.vlgmr.msra.gmra.mxu1 %v152_v25 }
 0x103   :  { %641 = vmatprep.mubr.msk.bf16.mxu1 %vm797_vm0, %v796_v0  ;;  %626 = vmatpush3.bf16.msra.mxu1 %v674_v29 }
 0x104   :  { %627 = vmatprep.subr.bf16.mxu1 %v796_v0 }
 0x107   :  { %628 = vmatpush3.bf16.msra.mxu1 %v675_v30 }
 0x108   :  { %629 = vmatprep.subr.bf16.mxu1 %v796_v0 }
 0x10b   :  { %630 = vmatpush3.bf16.msra.mxu1 %v676_v31 }
 0x10c   :  { %631 = vmatprep.subr.bf16.mxu1 %v796_v0 }
 0x10f   :  { %632 = vmatpush3.bf16.msra.mxu1 %v677_v32 }
 0x110   :  { %633 = vmatprep.subr.bf16.mxu1 %v796_v0 }
 0x113   :  { %634 = vmatpush3.bf16.msra.mxu1 %v678_v33 }
 0x114   :  { %635 = vmatprep.subr.bf16.mxu1 %v796_v0 }
 0x117   :  { %636 = vmatpush3.bf16.msra.mxu1 %v679_v44 }
 0x118   :  { %637 = vmatprep.subr.bf16.mxu1 %v796_v0 }
 0x11b   :  { %638 = vmatpush3.bf16.msra.mxu1 %v680_v45 }
 0x11c   :  { %639 = vmatprep.subr.bf16.mxu1 %v796_v0 }
 0x11f   :  { %640 = vmatpush3.bf16.msra.mxu1 %v681_v46 }
 0x1c2   :  { %v258_v35 = vpop.f32.mrf.mxu1 }
 0x1c3   :  { %v259_v37 = vadd.f32 %v522_v34, %v258_v35 }
 0x1c4   :  { %v603_v36 = vpop.f32.mrf.mxu1 }
 0x1c5   :  { %v265_v41 = vmax.f32 %v259_v37, 0.0 }
 0x1c6   :  { %v261_v38 = vpop.f32.mrf.mxu1 }
 0x1c7   :  { %v262_v39 = vadd.f32 %v522_v34, %v261_v38 }
 0x1c8   :  { %v604_v40 = vpop.f32.mrf.mxu1 }
 0x1c9   :  { %v266_v42 = vmax.f32 %v262_v39, 0.0 }
 0x1cb   :  { %v267_v43 = vpack.c.bf16 %v266_v42, %v265_v41 }
 0x1cd   :  { %622 = vmatmul.mubr.bf16.vlgmr.msra.gmra.mxu0 %v267_v43 }
 0x28d   :  { %v375_v48 = vpop.f32.mrf.mxu0 }
 0x28e   :  { %v376_v50 = vadd.f32 %v532_v47, %v375_v48 }
 0x28f   :  { %v623_v49 = vpop.f32.mrf.mxu0 }
 0x290   :  { %v382_v54 = vmax.f32 %v376_v50, 0.0 }
 0x291   :  { %v378_v51 = vpop.f32.mrf.mxu0 }
 0x292   :  { %v379_v52 = vadd.f32 %v532_v47, %v378_v51 }
 0x293   :  { %v624_v53 = vpop.f32.mrf.mxu0 }
 0x294   :  { %v383_v55 = vmax.f32 %v379_v52, 0.0 }
 0x296   :  { %v384_v56 = vpack.c.bf16 %v383_v55, %v382_v54 }
 0x298   :  { %642 = vmatmul.mubr.bf16.vlgmr.msra.gmra.mxu1 %v384_v56 }
 0x358   :  { %v490_v58 = vpop.f32.mrf.mxu1 }
 0x359   :  { %v491_v59 = vadd.f32 %v541_v57, %v490_v58 }
 0x35a   :  { %v643_v60 = vpop.f32.mrf.mxu1 }
 0x35b   :  { %497 = vst [vmem:[#allocation10] sm:$0xff] %v491_v59 }
 0x35c   :  { %v493_v61 = vpop.f32.mrf.mxu1 }
 0x35d   :  { %v494_v62 = vadd.f32 %v541_v57, %v493_v61 }
 0x35e   :  { %v644_v63 = vpop.f32.mrf.mxu1 }
 0x35f   :  { %498 = vst [vmem:[#allocation10 + $0x8] sm:$0xff] %v494_v62 }
 0x360   :  { %773 = shalt.err (!%p770_p10)
}
 0x361   :  { %s799_s28 = smov 128   ;;  %s800_s6 = smov 8  }
 0x362   :  { %510 = dma.vmem_to_hbm [thread:$0]  %s505_s27, 256, %s920_s7, [#allocation4], %s799_s28, %s799_s28, %s800_s6  }
 0x363   :  { %788 = dma.done.wait [#allocation4], 256  }
 0x364   :  { %789 = vsyncadd [#allocation4], 4294967040 }
 0x365   :  { %514 = vsyncpa [#allocation3], 1 }
 0x366   :  { %515 = vsyncpa [#allocation6], 1 }
 0x367   :  { %516 = vsyncpa [#allocation9], 1 }
 0x368   :  { %517 = vsyncpa [#allocation4], 1 }

// kernel: tpu_custom_call.1
= control target key start
LH: loop header
LB: loop body
LE: loop exit
PB: predicated region body
PF: predicated region fallthrough
CT: control target
= control target key end

     0   :  { %12 = vsyncpa [#allocation3], 0  ;;  %s913_s0 = inlined_call_operand.hbm [shape: bf16[16,16], index: 0, kind: input, shape index: {}]   ;;  %s914_s1 = inlined_call_operand.hbm [shape: bf16[16,128], index: 1, kind: input, shape index: {}]   ;;  %s915_s2 = inlined_call_operand.vmem [shape: f32[1,128], index: 2, kind: input, shape index: {}]   ;;  %s916_s3 = inlined_call_operand.hbm [shape: bf16[2,128,128], index: 3, kind: input, shape index: {}]   ;;  %s917_s4 = inlined_call_operand.vmem [shape: f32[2,1,128], index: 4, kind: input, shape index: {}]   ;;  %s918_s5 = inlined_call_operand.hbm [shape: bf16[128,128], index: 5, kind: input, shape index: {}]   ;;  %s919_s6 = inlined_call_operand.vmem [shape: f32[1,128], index: 6, kind: input, shape index: {}]   ;;  %s920_s7 = inlined_call_operand.hbm [shape: f32[16,128], index: 7, kind: output, shape index: {}]  }
   0x1   :  { %13 = vsyncpa [#allocation6], 0 }
   0x2   :  { %14 = vsyncpa [#allocation9], 0 }
   0x3   :  { %15 = vsyncpa [#allocation4], 0  ;;  %s790_s24 = smov [#allocation5]   ;;  %s791_s26 = smov [#allocation2]  }
   0x4   :  { %s33_s25 = sshll.u32 %s790_s24, 4  ;;  %s21_s27 = sshll.u32 %s791_s26, 4  ;;  %s34_s25 = int_to_ptr.vmem [resolvable:$true] %s33_s25  ;;  %s22_s27 = int_to_ptr.vmem [resolvable:$true] %s21_s27 }
   0x5   :  { %s690_s28 = scalar_lea.vmem %s34_s25, 128  ;;  %p695_p1 = scmp.lt.s32.totalorder %s34_s25, %s34_s25 }
   0x6   :  { %p691_p0 = scmp.ne.s32.totalorder %s34_s25, %s690_s28  ;;  %p696_p2 = scmp.lt.s32.totalorder %s690_s28, %s690_s28 }
   0x8   :  { %p697_p3 = por %p696_p2, %p695_p1 }
   0xa   :  { %p698_p4 = pnand %p697_p3, %p691_p0 }
   0xc   :  { %701 = shalt.err (!%p698_p4)
}
   0xd   :  { %s792_s29 = smov 64   ;;  %s793_s30 = smov 4  }
   0xe   :  { %39 = dma.hbm_to_vmem [thread:$0]  %s914_s1, 128, %s34_s25, [#allocation6], %s792_s29, %s792_s29, %s793_s30  }
   0xf   :  { %s710_s10 = scalar_lea.vmem %s22_s27, 128  ;;  %p715_p6 = scmp.lt.s32.totalorder %s22_s27, %s22_s27 }
  0x10   :  { %p711_p5 = scmp.ne.s32.totalorder %s22_s27, %s710_s10  ;;  %p716_p7 = scmp.lt.s32.totalorder %s710_s10, %s710_s10 }
  0x12   :  { %p717_p8 = por %p716_p7, %p715_p6 }
  0x14   :  { %p718_p9 = pnand %p717_p8, %p711_p5 }
  0x16   :  { %721 = shalt.err (!%p718_p9)
}
  0x17   :  { %27 = dma.hbm_to_vmem [thread:$0]  %s913_s0, 128, %s22_s27, [#allocation3], %s792_s29, %s792_s29, %s793_s30  }
  0x18   :  { %s794_s13 = smov [#allocation7]   ;;  %s795_s15 = smov [#allocation8]  }
  0x19   :  { %s47_s14 = sshll.u32 %s794_s13, 4  ;;  %s61_s16 = sshll.u32 %s795_s15, 4  ;;  %s48_s14 = int_to_ptr.vmem [resolvable:$true] %s47_s14  ;;  %s62_s16 = int_to_ptr.vmem [resolvable:$true] %s61_s16 }
  0x1a   :  { %s730_s1 = scalar_lea.vmem %s48_s14, 2048  ;;  %p735_p11 = scmp.lt.s32.totalorder %s48_s14, %s48_s14 }
  0x1b   :  { %p731_p10 = scmp.ne.s32.totalorder %s48_s14, %s730_s1  ;;  %p736_p12 = scmp.lt.s32.totalorder %s730_s1, %s730_s1 }
  0x1d   :  { %p737_p13 = por %p736_p12, %p735_p11 }
  0x1f   :  { %p738_p0 = pnand %p737_p13, %p731_p10 }
  0x21   :  { %741 = shalt.err (!%p738_p0)
}
  0x22   :  { %53 = dma.hbm_to_vmem [thread:$0]  %s916_s3, 2048, %s48_s14, [#allocation6], %s792_s29, %s792_s29, %s793_s30  }
  0x23   :  { %s750_s0 = scalar_lea.vmem %s62_s16, 1024  ;;  %p755_p2 = scmp.lt.s32.totalorder %s62_s16, %s62_s16 }
  0x24   :  { %p751_p1 = scmp.ne.s32.totalorder %s62_s16, %s750_s0  ;;  %p756_p3 = scmp.lt.s32.totalorder %s750_s0, %s750_s0 }
  0x26   :  { %p757_p4 = por %p756_p3, %p755_p2 }
  0x28   :  { %p758_p5 = pnand %p757_p4, %p751_p1 }
  0x2a   :  { %761 = shalt.err (!%p758_p5)
}
  0x2b   :  { %67 = dma.hbm_to_vmem [thread:$0]  %s918_s5, 1024, %s62_s16, [#allocation9], %s792_s29, %s792_s29, %s793_s30  }
  0x2c   :  { %782 = dma.done.wait [#allocation3], 128  }
  0x2d   :  { %783 = vsyncadd [#allocation3], 4294967168 }
  0x2e   :  { %784 = dma.done.wait [#allocation6], 2176  }
  0x2f   :  { %785 = vsyncadd [#allocation6], 4294965120 }
  0x30   :  { %786 = dma.done.wait [#allocation9], 1024  }
  0x31   :  { %787 = vsyncadd [#allocation9], 4294966272  ;;  %v796_v0 = vmov 0.0   ;;  %vm797_vm0 = vmmov 0   ;;  %v656_v1 = vld [vmem:[#allocation5] sm:$0xff]   ;;  %v657_v2 = vld [vmem:[#allocation2] sm:$0xff]  }
  0x32   :  { %579 = vmatprep.subr.bf16.mxu0 %v796_v0  ;;  %581 = vmatprep.mubr.msk.bf16.mxu0 %vm797_vm0, %v796_v0  ;;  %vm105_vm1 = vcmask 130048   ;;  %v658_v3 = vld [vmem:[#allocation7 + $0x38] sm:$0xff]   ;;  %v659_v4 = vld [vmem:[#allocation7 + $0x30] sm:$0xff]   ;;  %v660_v5 = vld [vmem:[#allocation7 + $0x28] sm:$0xff]   ;;  %s798_s26 = smov [#allocation10]  }
  0x33   :  { %585 = vmatprep.subr.bf16.mxu1 %v796_v0  ;;  %601 = vmatprep.mubr.msk.bf16.mxu1 %vm797_vm0, %v796_v0  ;;  %v661_v6 = vld [vmem:[#allocation7 + $0x20] sm:$0xff]   ;;  %v662_v7 = vld [vmem:[#allocation7 + $0x18] sm:$0xff]   ;;  %v663_v8 = vld [vmem:[#allocation7 + $0x10] sm:$0xff]   ;;  %s504_s27 = sshll.u32 %s798_s26, 4  ;;  %s505_s27 = int_to_ptr.vmem [resolvable:$true] %s504_s27 }
  0x34   :  { %580 = vmatpush3.bf16.msra.mxu0 %v656_v1  ;;  %586 = vmatpush3.bf16.msra.mxu1 %v658_v3  ;;  %v664_v9 = vld [vmem:[#allocation7 + $0x8] sm:$0xff]   ;;  %v665_v10 = vld [vmem:[#allocation7] sm:$0xff]   ;;  %v666_v11 = vld [vmem:[#allocation7 + $0x78] sm:$0xff]   ;;  %p767_p7 = scmp.lt.s32.totalorder %s505_s27, %s505_s27 }
  0x35   :  { %605 = vmatprep.subr.bf16.mxu0 %v796_v0  ;;  %587 = vmatprep.subr.bf16.mxu1 %v796_v0  ;;  %v667_v12 = vld [vmem:[#allocation7 + $0x70] sm:$0xff]   ;;  %v668_v13 = vld [vmem:[#allocation7 + $0x68] sm:$0xff]   ;;  %v669_v14 = vld [vmem:[#allocation7 + $0x60] sm:$0xff]  }
  0x36   :  { %v670_v15 = vld [vmem:[#allocation7 + $0x58] sm:$0xff]   ;;  %v518_v16 = vld [vmem:[%s915_s2] ss:$0 sm:$0xff]  ;;  %v672_v27 = vld [vmem:[#allocation7 + $0x48] sm:$0xff]  }
  0x37   :  { %582 = vmatmul.mubr.msk.bf16.vlgmr.msra.gmra.mxu0 %vm105_vm1, %v657_v2  ;;  %v671_v26 = vld [vmem:[#allocation7 + $0x50] sm:$0xff]   ;;  %v673_v28 = vld [vmem:[#allocation7 + $0x40] sm:$0xff]   ;;  %v674_v29 = vld [vmem:[#allocation8 + $0x38] sm:$0xff]  }
  0x38   :  { %621 = vmatprep.mubr.msk.bf16.mxu0 %vm797_vm0, %v796_v0  ;;  %588 = vmatpush3.bf16.msra.mxu1 %v659_v4  ;;  %v675_v30 = vld [vmem:[#allocation8 + $0x30] sm:$0xff]   ;;  %v676_v31 = vld [vmem:[#allocation8 + $0x28] sm:$0xff]   ;;  %v677_v32 = vld [vmem:[#allocation8 + $0x20] sm:$0xff]  }
  0x39   :  { %589 = vmatprep.subr.bf16.mxu1 %v796_v0  ;;  %606 = vmatpush3.bf16.msra.mxu0 %v666_v11  ;;  %v678_v33 = vld [vmem:[#allocation8 + $0x18] sm:$0xff]   ;;  %v522_v34 = vld [vmem:[%s917_s4] ss:$0 sm:$0xff]  ;;  %v680_v45 = vld [vmem:[#allocation8 + $0x8] sm:$0xff]  }
  0x3a   :  { %607 = vmatprep.subr.bf16.mxu0 %v796_v0  ;;  %v679_v44 = vld [vmem:[#allocation8 + $0x10] sm:$0xff]   ;;  %v681_v46 = vld [vmem:[#allocation8] sm:$0xff]  }
  0x3b   :  { %v532_v47 = vld [vmem:[%s917_s4 + $0x1] ss:$0 sm:$0xff]  ;;  %v541_v57 = vld [vmem:[%s919_s6] ss:$0 sm:$0xff]  ;;  %s762_s4 = scalar_lea.vmem %s505_s27, 256 }
  0x3c   :  { %590 = vmatpush3.bf16.msra.mxu1 %v660_v5  ;;  %p763_p6 = scmp.ne.s32.totalorder %s505_s27, %s762_s4  ;;  %p768_p8 = scmp.lt.s32.totalorder %s762_s4, %s762_s4 }
  0x3d   :  { %591 = vmatprep.subr.bf16.mxu1 %v796_v0  ;;  %608 = vmatpush3.bf16.msra.mxu0 %v667_v12 }
  0x3e   :  { %609 = vmatprep.subr.bf16.mxu0 %v796_v0  ;;  %p769_p9 = por %p768_p8, %p767_p7 }
  0x40   :  { %592 = vmatpush3.bf16.msra.mxu1 %v661_v6  ;;  %p770_p10 = pnand %p769_p9, %p763_p6 }
  0x41   :  { %593 = vmatprep.subr.bf16.mxu1 %v796_v0  ;;  %610 = vmatpush3.bf16.msra.mxu0 %v668_v13 }
  0x42   :  { %611 = vmatprep.subr.bf16.mxu0 %v796_v0 }
  0x44   :  { %594 = vmatpush3.bf16.msra.mxu1 %v662_v7 }
  0x45   :  { %595 = vmatprep.subr.bf16.mxu1 %v796_v0  ;;  %612 = vmatpush3.bf16.msra.mxu0 %v669_v14 }
  0x46   :  { %613 = vmatprep.subr.bf16.mxu0 %v796_v0 }
  0x48   :  { %596 = vmatpush3.bf16.msra.mxu1 %v663_v8 }
  0x49   :  { %597 = vmatprep.subr.bf16.mxu1 %v796_v0  ;;  %614 = vmatpush3.bf16.msra.mxu0 %v670_v15 }
  0x4a   :  { %615 = vmatprep.subr.bf16.mxu0 %v796_v0 }
  0x4c   :  { %598 = vmatpush3.bf16.msra.mxu1 %v664_v9 }
  0x4d   :  { %599 = vmatprep.subr.bf16.mxu1 %v796_v0  ;;  %616 = vmatpush3.bf16.msra.mxu0 %v671_v26 }
  0x4e   :  { %617 = vmatprep.subr.bf16.mxu0 %v796_v0 }
  0x50   :  { %600 = vmatpush3.bf16.msra.mxu1 %v665_v10 }
  0x51   :  { %625 = vmatprep.subr.bf16.mxu1 %v796_v0  ;;  %618 = vmatpush3.bf16.msra.mxu0 %v672_v27 }
  0x52   :  { %619 = vmatprep.subr.bf16.mxu0 %v796_v0 }
  0x55   :  { %620 = vmatpush3.bf16.msra.mxu0 %v673_v28 }
  0xf7   :  { %v143_v17 = vpop.f32.mrf.mxu0 }
  0xf8   :  { %v144_v19 = vadd.f32 %v518_v16, %v143_v17 }
  0xf9   :  { %v583_v18 = vpop.f32.mrf.mxu0 }
  0xfa   :  { %v150_v23 = vmax.f32 %v144_v19, 0.0 }
  0xfb   :  { %v146_v20 = vpop.f32.mrf.mxu0 }
  0xfc   :  { %v147_v21 = vadd.f32 %v518_v16, %v146_v20 }
  0xfd   :  { %v584_v22 = vpop.f32.mrf.mxu0 }
  0xfe   :  { %v151_v24 = vmax.f32 %v147_v21, 0.0 }
 0x100   :  { %v152_v25 = vpack.c.bf16 %v151_v24, %v150_v23 }
 0x102   :  { %602 = vmatmul.mubr.bf16.vlgmr.msra.gmra.mxu1 %v152_v25 }
 0x103   :  { %641 = vmatprep.mubr.msk.bf16.mxu1 %vm797_vm0, %v796_v0  ;;  %626 = vmatpush3.bf16.msra.mxu1 %v674_v29 }
 0x104   :  { %627 = vmatprep.subr.bf16.mxu1 %v796_v0 }
 0x107   :  { %628 = vmatpush3.bf16.msra.mxu1 %v675_v30 }
 0x108   :  { %629 = vmatprep.subr.bf16.mxu1 %v796_v0 }
 0x10b   :  { %630 = vmatpush3.bf16.msra.mxu1 %v676_v31 }
 0x10c   :  { %631 = vmatprep.subr.bf16.mxu1 %v796_v0 }
 0x10f   :  { %632 = vmatpush3.bf16.msra.mxu1 %v677_v32 }
 0x110   :  { %633 = vmatprep.subr.bf16.mxu1 %v796_v0 }
 0x113   :  { %634 = vmatpush3.bf16.msra.mxu1 %v678_v33 }
 0x114   :  { %635 = vmatprep.subr.bf16.mxu1 %v796_v0 }
 0x117   :  { %636 = vmatpush3.bf16.msra.mxu1 %v679_v44 }
 0x118   :  { %637 = vmatprep.subr.bf16.mxu1 %v796_v0 }
 0x11b   :  { %638 = vmatpush3.bf16.msra.mxu1 %v680_v45 }
 0x11c   :  { %639 = vmatprep.subr.bf16.mxu1 %v796_v0 }
 0x11f   :  { %640 = vmatpush3.bf16.msra.mxu1 %v681_v46 }
 0x1c2   :  { %v258_v35 = vpop.f32.mrf.mxu1 }
 0x1c3   :  { %v259_v37 = vadd.f32 %v522_v34, %v258_v35 }
 0x1c4   :  { %v603_v36 = vpop.f32.mrf.mxu1 }
 0x1c5   :  { %v265_v41 = vmax.f32 %v259_v37, 0.0 }
 0x1c6   :  { %v261_v38 = vpop.f32.mrf.mxu1 }
 0x1c7   :  { %v262_v39 = vadd.f32 %v522_v34, %v261_v38 }
 0x1c8   :  { %v604_v40 = vpop.f32.mrf.mxu1 }
 0x1c9   :  { %v266_v42 = vmax.f32 %v262_v39, 0.0 }
 0x1cb   :  { %v267_v43 = vpack.c.bf16 %v266_v42, %v265_v41 }
 0x1cd   :  { %622 = vmatmul.mubr.bf16.vlgmr.msra.gmra.mxu0 %v267_v43 }
 0x28d   :  { %v375_v48 = vpop.f32.mrf.mxu0 }
 0x28e   :  { %v376_v50 = vadd.f32 %v532_v47, %v375_v48 }
 0x28f   :  { %v623_v49 = vpop.f32.mrf.mxu0 }
 0x290   :  { %v382_v54 = vmax.f32 %v376_v50, 0.0 }
 0x291   :  { %v378_v51 = vpop.f32.mrf.mxu0 }
 0x292   :  { %v379_v52 = vadd.f32 %v532_v47, %v378_v51 }
 0x293   :  { %v624_v53 = vpop.f32.mrf.mxu0 }
 0x294   :  { %v383_v55 = vmax.f32 %v379_v52, 0.0 }
 0x296   :  { %v384_v56 = vpack.c.bf16 %v383_v55, %v382_v54 }
 0x298   :  { %642 = vmatmul.mubr.bf16.vlgmr.msra.gmra.mxu1 %v384_v56 }
 0x358   :  { %v490_v58 = vpop.f32.mrf.mxu1 }
 0x359   :  { %v491_v59 = vadd.f32 %v541_v57, %v490_v58 }
 0x35a   :  { %v643_v60 = vpop.f32.mrf.mxu1 }
 0x35b   :  { %497 = vst [vmem:[#allocation10] sm:$0xff] %v491_v59 }
 0x35c   :  { %v493_v61 = vpop.f32.mrf.mxu1 }
 0x35d   :  { %v494_v62 = vadd.f32 %v541_v57, %v493_v61 }
 0x35e   :  { %v644_v63 = vpop.f32.mrf.mxu1 }
 0x35f   :  { %498 = vst [vmem:[#allocation10 + $0x8] sm:$0xff] %v494_v62 }
 0x360   :  { %773 = shalt.err (!%p770_p10)
}
 0x361   :  { %s799_s28 = smov 128   ;;  %s800_s6 = smov 8  }
 0x362   :  { %510 = dma.vmem_to_hbm [thread:$0]  %s505_s27, 256, %s920_s7, [#allocation4], %s799_s28, %s799_s28, %s800_s6  }
 0x363   :  { %788 = dma.done.wait [#allocation4], 256  }
 0x364   :  { %789 = vsyncadd [#allocation4], 4294967040 }
 0x365   :  { %514 = vsyncpa [#allocation3], 1 }
 0x366   :  { %515 = vsyncpa [#allocation6], 1 }
 0x367   :  { %516 = vsyncpa [#allocation9], 1 }
 0x368   :  { %517 = vsyncpa [#allocation4], 1 }

</bundles_post_ra>
